<compile_context>
chip_gen: v5e
topology: v5e:2x2
jax: 0.10.0
libtpu: 0.0.40
codegen_flags: <defaults>
</compile_context>

<pallas_src>
import functools

import jax
import jax.numpy as jnp
from jax import lax
from jax.experimental import pallas as pl
from jax.experimental.pallas import tpu as pltpu

_LANES = 128


def _textcnn_kernel(x_ref, w_ref, b_ref, tmax_ref, ln_g_ref, ln_b_ref,
                    seg_ref, fc_w_ref, fc_b_ref, out_ref,
                    *, max_k, tb, seq_len, n_channels, n_classes, ln_eps):
    """One grid step == TB batch rows: fused conv x3 + relu + pool + LN + fc + log_softmax."""
    n_rows = tb * seq_len                                   # static
    x2d = x_ref[...]                                        # (TB*L, E) bf16

    # Single wide MXU matmul: every tap of every branch at once.
    # y[:, j*128 + b*C + c] = sum_e x2d[:, e] * conv_w[b][c, e, j]
    y = jnp.dot(x2d, w_ref[...], preferred_element_type=jnp.float32)   # (TB*L, max_k*128) f32

    # Accumulate shift groups: conv out[r] += y_j[r + j]  ->  roll by -j rows.
    # Lane slices are 128-aligned (free); rolls hit the XLU slot.
    acc = y[:, :_LANES]
    for j in range(1, max_k):
        acc = acc + pltpu.roll(y[:, j * _LANES:(j + 1) * _LANES],
                               shift=n_rows - j, axis=0)

    acc = jnp.maximum(acc + b_ref[...], 0.0)                 # bias + ReLU (f32)
    acc = acc.reshape(tb, seq_len, _LANES)

    # Mask invalid conv positions (t >= L-k_b+1, per-branch limit packed per lane
    # in tmax).  Rolled tail rows hold wrapped / cross-row garbage; zeroing them
    # after ReLU is max-safe because every valid ReLU output is >= 0.
    t_idx = lax.broadcasted_iota(jnp.int32, (1, seq_len, _LANES), 1)
    valid_t = t_idx < tmax_ref[...].reshape(1, 1, _LANES)
    pooled = jnp.max(jnp.where(valid_t, acc, 0.0), axis=1)   # (TB, 128)

    # LayerNorm per branch segment of C lanes (conv0_ln applied to every branch,
    # as in the PyTorch forward).  Segment sums via a tiny 0/1 (128,128) matmul:
    # each lane receives its branch's sum broadcast back (MXU, no lane shuffles).
    inv_c = 1.0 / n_channels
    seg = seg_ref[...]
    mean = jnp.dot(pooled, seg, preferred_element_type=jnp.float32) * inv_c
    cent = pooled - mean
    var = jnp.dot(cent * cent, seg, preferred_element_type=jnp.float32) * inv_c
    feat = cent * lax.rsqrt(var + ln_eps) * ln_g_ref[...] + ln_b_ref[...]   # (TB, 128)

    # dropout: identity (inference).  fc over the concatenated features as a
    # single matmul (features already lane-contiguous at lanes 0..3C-1).
    logits = (jnp.dot(feat, fc_w_ref[...], preferred_element_type=jnp.float32)
              + fc_b_ref[...])                               # (TB, 128) f32

    # Masked log_softmax over the first n_classes lanes (padded lanes excluded).
    lane = lax.broadcasted_iota(jnp.int32, logits.shape, 1)
    valid_c = lane < n_classes
    m = jnp.max(jnp.where(valid_c, logits, -1e30), axis=-1, keepdims=True)
    s = logits - m
    lse = jnp.log(jnp.sum(jnp.where(valid_c, jnp.exp(s), 0.0), axis=-1, keepdims=True))
    out_ref[...] = s - lse                                   # (TB, 128) f32


def textcnn_forward(tokens, params, *, kernel_sizes, tb=32, ln_eps=1e-5,
                    vmem_limit_mb=32):
    """tokens: (B, L) int32 ids. Returns log-probs (B, n_classes) fp32."""
    n_b = len(kernel_sizes)
    max_k = max(kernel_sizes)

    # Embedding lookup in bf16 (halves HBM traffic of the dominant activation).
    x = params["emb"].astype(jnp.bfloat16)[tokens]           # (B, L, E) bf16
    B, L, E = x.shape
    C = params["conv_w"][0].shape[0]
    n_cls = params["fc_w"].shape[0]

    assert tb % 8 == 0, "TB must be a multiple of 8 (f32 sublane tiling)"
    assert L % 8 == 0, "L must be a multiple of 8 for the free (TB*L,.)->(TB,L,.) reshape"
    assert n_b * C <= _LANES, "concatenated features must fit in one 128-lane slab"
    assert n_cls <= _LANES
    assert max_k <= L

    # Pad the batch to a multiple of TB.  Padded rows produce finite garbage
    # (LayerNorm on a near-constant pooled vector) and are sliced off below;
    # they must never be consumed downstream.
    B_pad = pl.cdiv(B, tb) * tb
    if B_pad != B:
        x = jnp.concatenate([x, jnp.zeros((B_pad - B, L, E), x.dtype)], axis=0)
    x2d = x.reshape(B_pad * L, E)                            # batch folded into matmul M

    # ---- fused conv weights: (E, max_k*128) bf16.
    # Shift group j occupies lanes [j*128, (j+1)*128); inside it, branch b's
    # tap-j channels sit at lanes [b*C, (b+1)*C).  Unused lanes are zero, so
    # they contribute exactly 0 everywhere downstream.
    w_fused = jnp.zeros((E, max_k * _LANES), jnp.float32)
    b_slab = jnp.zeros((1, _LANES), jnp.float32)
    tmax = jnp.zeros((1, _LANES), jnp.int32)
    ln_g = jnp.zeros((1, _LANES), jnp.float32)
    ln_b = jnp.zeros((1, _LANES), jnp.float32)
    for b_i, k in enumerate(kernel_sizes):
        w = params["conv_w"][b_i]                            # torch layout (C, E, k)
        lo, hi = b_i * C, (b_i + 1) * C
        for j in range(k):
            w_fused = w_fused.at[:, j * _LANES + lo:j * _LANES + hi].set(
                jnp.transpose(w[:, :, j], (1, 0)))           # (E, C)
        b_slab = b_slab.at[0, lo:hi].set(params["conv_b"][b_i])
        tmax = tmax.at[0, lo:hi].set(L - k + 1)
        ln_g = ln_g.at[0, lo:hi].set(params["ln_g"])         # conv0_ln shared by all branches
        ln_b = ln_b.at[0, lo:hi].set(params["ln_b"])
    w_fused = w_fused.astype(jnp.bfloat16)

    # 0/1 branch-segment matrix for LN mean/var via MXU (f32, exact sums).
    lane = jnp.arange(_LANES)
    seg_id = jnp.where(lane < n_b * C, lane // C, n_b)
    seg = (seg_id[:, None] == seg_id[None, :]).astype(jnp.float32)

    # fc: torch (n_cls, 3C) -> (128, 128) f32, rows 0..3C-1 / cols 0..n_cls-1
    # populated, rest zero; bias padded to (1, 128).
    fc_w = jnp.zeros((_LANES, _LANES), jnp.float32)
    fc_w = fc_w.at[:n_b * C, :n_cls].set(jnp.transpose(params["fc_w"], (1, 0)))
    fc_b = jnp.zeros((1, _LANES), jnp.float32).at[0, :n_cls].set(params["fc_b"])

    kernel = functools.partial(_textcnn_kernel, max_k=max_k, tb=tb, seq_len=L,
                               n_channels=C, n_classes=n_cls, ln_eps=ln_eps)
    full = lambda shape: pl.BlockSpec(shape, lambda i: (0,) * len(shape))

    out = pl.pallas_call(
        kernel,
        out_shape=jax.ShapeDtypeStruct((B_pad, _LANES), jnp.float32),
        grid_spec=pltpu.PrefetchScalarGridSpec(
            num_scalar_prefetch=0,
            grid=(B_pad // tb,),
            in_specs=[
                pl.BlockSpec((tb * L, E), lambda i: (i, 0)),   # x (TB*L, E) bf16
                full(w_fused.shape),                           # fused conv weights
                full(b_slab.shape), full(tmax.shape),          # conv bias, valid-t limits
                full(ln_g.shape), full(ln_b.shape),            # LN gamma/beta slabs
                full(seg.shape),                               # LN segment-sum matrix
                full(fc_w.shape), full(fc_b.shape),            # fc weight/bias
            ],
            out_specs=pl.BlockSpec((tb, _LANES), lambda i: (i, 0)),
        ),
        compiler_params=pltpu.CompilerParams(
            dimension_semantics=("parallel",),
            vmem_limit_bytes=vmem_limit_mb * 1024 * 1024),
    )(x2d, w_fused, b_slab, tmax, ln_g, ln_b, seg, fc_w, fc_b)

    # Load-bearing slice: drops padded batch rows and padded class lanes.
    return out[:B, :n_cls]


def reference_forward(tokens, params, *, kernel_sizes, ln_eps=1e-5):
    """Pure-JAX reference mirroring the PyTorch forward (eval mode).

    Conv matmul inputs are bf16 with f32 accumulation, like the kernel, so the
    comparison only sees summation-order-level differences.
    """
    x = params["emb"].astype(jnp.bfloat16)[tokens]           # (B, L, E) bf16
    B, L, E = x.shape
    feats = []
    for i, k in enumerate(kernel_sizes):
        w = params["conv_w"][i].astype(jnp.bfloat16)         # (C, E, k)
        b = params["conv_b"][i]
        l_out = L - k + 1
        acc = jnp.zeros((B, l_out, w.shape[0]), jnp.float32)
        for j in range(k):
            acc = acc + jnp.einsum("ble,ce->blc", x[:, j:j + l_out, :], w[:, :, j],
                                   preferred_element_type=jnp.float32)
        acc = jnp.maximum(acc + b[None, None, :], 0.0)
        pooled = jnp.max(acc, axis=1)                        # (B, C)
        mean = jnp.mean(pooled, axis=-1, keepdims=True)
        var = jnp.mean((pooled - mean) ** 2, axis=-1, keepdims=True)
        feats.append((pooled - mean) * lax.rsqrt(var + ln_eps)
                     * params["ln_g"][None, :] + params["ln_b"][None, :])
    feat = jnp.concatenate(feats, axis=1)                    # (B, 3C) f32
    logits = feat @ params["fc_w"].T + params["fc_b"][None, :]
    return jax.nn.log_softmax(logits, axis=1)


def make_params(key, *, vocab_size, embedding_dim, out_channels, kernel_sizes, class_num):
    """Parameters in PyTorch layouts (Conv1d (C,E,k), Linear (n_cls, 3C))."""
    n_b = len(kernel_sizes)
    keys = jax.random.split(key, 2 * n_b + 3)
    it = iter(keys)
    u = lambda k, shape, s=0.1: jax.random.uniform(k, shape, jnp.float32, -s, s)

    conv_w = [u(next(it), (out_channels, embedding_dim, ks)) for ks in kernel_sizes]
    conv_b = [u(next(it), (out_channels,)) for _ in kernel_sizes]
    return {
        "emb": u(next(it), (vocab_size, embedding_dim), 1.0),
        "conv_w": conv_w,
        "conv_b": conv_b,
        "ln_g": jnp.ones((out_channels,), jnp.float32),      # nn.LayerNorm default init
        "ln_b": jnp.zeros((out_channels,), jnp.float32),
        "fc_w": u(next(it), (class_num, n_b * out_channels), 0.5),
        "fc_b": jnp.zeros((class_num,), jnp.float32),
    }


if __name__ == "__main__":
    args = dict(vocab_size=50, embedding_dim=32, out_channels=16,
                kernel_size=[2, 3, 4], dropout=0.5, class_num=6)
    B, L, TB = 32, 16, 8      # 4 grid steps -> even count, both v7x TensorCores busy

    key = jax.random.PRNGKey(0)
    k_par, k_tok = jax.random.split(key)
    params = make_params(k_par,
                         vocab_size=args["vocab_size"],
                         embedding_dim=args["embedding_dim"],
                         out_channels=args["out_channels"],
                         kernel_sizes=args["kernel_size"],
                         class_num=args["class_num"])
    tokens = jax.random.randint(k_tok, (B, L), 0, args["vocab_size"], dtype=jnp.int32)

    fwd = jax.jit(functools.partial(textcnn_forward,
                                    kernel_sizes=tuple(args["kernel_size"]), tb=TB))
    out = jax.block_until_ready(fwd(tokens, params))

    ref = reference_forward(tokens, params, kernel_sizes=args["kernel_size"])
    assert out.shape == (B, args["class_num"])
    assert jnp.allclose(out, ref, atol=2e-2, rtol=2e-2), "mismatch vs reference"

    print("KERNEL_OK")
</pallas_src>

<mosaic_0001>
module attributes {stable_mosaic.version = 11 : i64} {
  func.func @_textcnn_kernel(%arg0: i32, %arg1: memref<128x32xbf16, #tpu.memory_space<vmem>>, %arg2: memref<32x512xbf16, #tpu.memory_space<vmem>>, %arg3: memref<1x128xf32, #tpu.memory_space<vmem>>, %arg4: memref<1x128xi32, #tpu.memory_space<vmem>>, %arg5: memref<1x128xf32, #tpu.memory_space<vmem>>, %arg6: memref<1x128xf32, #tpu.memory_space<vmem>>, %arg7: memref<128x128xf32, #tpu.memory_space<vmem>>, %arg8: memref<128x128xf32, #tpu.memory_space<vmem>>, %arg9: memref<1x128xf32, #tpu.memory_space<vmem>>, %arg10: memref<8x128xf32, #tpu.memory_space<vmem>>) attributes {dimension_semantics = [#tpu.dimension_semantics<parallel>], iteration_bounds = array<i64: 4>, scalar_prefetch = 0 : i64, scratch_operands = 0 : i64, tpu.core_type = #tpu.core_type<tc>, window_params = [{transform_indices = @transform_0, window_bounds = array<i64: 128, 32>}, {pipeline_mode = #tpu.pipeline_mode<synchronous>, transform_indices = @transform_1, window_bounds = array<i64: 32, 512>}, {pipeline_mode = #tpu.pipeline_mode<synchronous>, transform_indices = @transform_2, window_bounds = array<i64: 1, 128>}, {pipeline_mode = #tpu.pipeline_mode<synchronous>, transform_indices = @transform_3, window_bounds = array<i64: 1, 128>}, {pipeline_mode = #tpu.pipeline_mode<synchronous>, transform_indices = @transform_4, window_bounds = array<i64: 1, 128>}, {pipeline_mode = #tpu.pipeline_mode<synchronous>, transform_indices = @transform_5, window_bounds = array<i64: 1, 128>}, {pipeline_mode = #tpu.pipeline_mode<synchronous>, transform_indices = @transform_6, window_bounds = array<i64: 128, 128>}, {pipeline_mode = #tpu.pipeline_mode<synchronous>, transform_indices = @transform_7, window_bounds = array<i64: 128, 128>}, {pipeline_mode = #tpu.pipeline_mode<synchronous>, transform_indices = @transform_8, window_bounds = array<i64: 1, 128>}, {transform_indices = @transform_9, window_bounds = array<i64: 8, 128>}]} {
    %c0 = arith.constant 0 : index
    %c0_0 = arith.constant 0 : index
    %0 = vector.load %arg1[%c0, %c0_0] : memref<128x32xbf16, #tpu.memory_space<vmem>>, vector<128x32xbf16>
    %c0_1 = arith.constant 0 : index
    %c0_2 = arith.constant 0 : index
    %1 = vector.load %arg2[%c0_1, %c0_2] : memref<32x512xbf16, #tpu.memory_space<vmem>>, vector<32x512xbf16>
    %cst = arith.constant dense<0.000000e+00> : vector<128x512xf32>
    %2 = tpu.matmul %0, %1, %cst {dimension_numbers = #tpu.dot_dimension_numbers<[1], [0], [0], [1], [0, 0, 1, 1], [], []>} : vector<128x32xbf16>, vector<32x512xbf16>, vector<128x512xf32> -> vector<128x512xf32>
    %3 = vector.extract_strided_slice %2 {offsets = [0, 0], sizes = [128, 128], strides = [1, 1]} : vector<128x512xf32> to vector<128x128xf32>
    %4 = vector.extract_strided_slice %2 {offsets = [0, 128], sizes = [128, 128], strides = [1, 1]} : vector<128x512xf32> to vector<128x128xf32>
    %c127_i32 = arith.constant 127 : i32
    %5 = tpu.dynamic_rotate %4 by %c127_i32 dim 0 : vector<128x128xf32>, i32 -> vector<128x128xf32>
    %6 = arith.addf %3, %5 : vector<128x128xf32>
    %7 = vector.extract_strided_slice %2 {offsets = [0, 256], sizes = [128, 128], strides = [1, 1]} : vector<128x512xf32> to vector<128x128xf32>
    %c126_i32 = arith.constant 126 : i32
    %8 = tpu.dynamic_rotate %7 by %c126_i32 dim 0 : vector<128x128xf32>, i32 -> vector<128x128xf32>
    %9 = arith.addf %6, %8 : vector<128x128xf32>
    %10 = vector.extract_strided_slice %2 {offsets = [0, 384], sizes = [128, 128], strides = [1, 1]} : vector<128x512xf32> to vector<128x128xf32>
    %c125_i32 = arith.constant 125 : i32
    %11 = tpu.dynamic_rotate %10 by %c125_i32 dim 0 : vector<128x128xf32>, i32 -> vector<128x128xf32>
    %12 = arith.addf %9, %11 : vector<128x128xf32>
    %c0_3 = arith.constant 0 : index
    %c0_4 = arith.constant 0 : index
    %13 = vector.load %arg3[%c0_3, %c0_4] : memref<1x128xf32, #tpu.memory_space<vmem>>, vector<1x128xf32>
    %14 = vector.broadcast %13 : vector<1x128xf32> to vector<128x128xf32>
    %15 = arith.addf %12, %14 : vector<128x128xf32>
    %cst_5 = arith.constant 0.000000e+00 : f32
    %16 = vector.broadcast %cst_5 : f32 to vector<128x128xf32>
    %17 = arith.maximumf %15, %16 : vector<128x128xf32>
    %18 = vector.shape_cast %17 : vector<128x128xf32> to vector<8x16x128xf32>
    %19 = tpu.iota {dimensions = array<i32: 1>} : vector<1x16x128xi32>
    %c0_6 = arith.constant 0 : index
    %c0_7 = arith.constant 0 : index
    %20 = vector.load %arg4[%c0_6, %c0_7] : memref<1x128xi32, #tpu.memory_space<vmem>>, vector<1x128xi32>
    %21 = vector.shape_cast %20 : vector<1x128xi32> to vector<1x1x128xi32>
    %22 = vector.broadcast %21 : vector<1x1x128xi32> to vector<1x16x128xi32>
    %23 = arith.cmpi slt, %19, %22 : vector<1x16x128xi32>
    %cst_8 = arith.constant 0.000000e+00 : f32
    %24 = vector.shape_cast %23 : vector<1x16x128xi1> to vector<1x16x128xi1>
    %25 = vector.broadcast %24 : vector<1x16x128xi1> to vector<8x16x128xi1>
    %26 = vector.broadcast %cst_8 : f32 to vector<8x16x128xf32>
    %27 = arith.select %25, %18, %26 : vector<8x16x128xi1>, vector<8x16x128xf32>
    %cst_9 = arith.constant dense<0xFF800000> : vector<8x128xf32>
    %28 = vector.multi_reduction <maximumf>, %27, %cst_9 [1] : vector<8x16x128xf32> to vector<8x128xf32>
    %c0_10 = arith.constant 0 : index
    %c0_11 = arith.constant 0 : index
    %29 = vector.load %arg7[%c0_10, %c0_11] : memref<128x128xf32, #tpu.memory_space<vmem>>, vector<128x128xf32>
    %cst_12 = arith.constant dense<0.000000e+00> : vector<8x128xf32>
    %30 = tpu.matmul %28, %29, %cst_12 {dimension_numbers = #tpu.dot_dimension_numbers<[1], [0], [0], [1], [0, 0, 1, 1], [], []>} : vector<8x128xf32>, vector<128x128xf32>, vector<8x128xf32> -> vector<8x128xf32>
    %cst_13 = arith.constant 6.250000e-02 : f32
    %31 = vector.broadcast %cst_13 : f32 to vector<8x128xf32>
    %32 = arith.mulf %30, %31 : vector<8x128xf32>
    %33 = arith.subf %28, %32 : vector<8x128xf32>
    %34 = arith.mulf %33, %33 : vector<8x128xf32>
    %cst_14 = arith.constant dense<0.000000e+00> : vector<8x128xf32>
    %35 = tpu.matmul %34, %29, %cst_14 {dimension_numbers = #tpu.dot_dimension_numbers<[1], [0], [0], [1], [0, 0, 1, 1], [], []>} : vector<8x128xf32>, vector<128x128xf32>, vector<8x128xf32> -> vector<8x128xf32>
    %cst_15 = arith.constant 6.250000e-02 : f32
    %36 = vector.broadcast %cst_15 : f32 to vector<8x128xf32>
    %37 = arith.mulf %35, %36 : vector<8x128xf32>
    %cst_16 = arith.constant 9.99999974E-6 : f32
    %38 = vector.broadcast %cst_16 : f32 to vector<8x128xf32>
    %39 = arith.addf %37, %38 : vector<8x128xf32>
    %40 = math.rsqrt %39 : vector<8x128xf32>
    %41 = arith.mulf %33, %40 : vector<8x128xf32>
    %c0_17 = arith.constant 0 : index
    %c0_18 = arith.constant 0 : index
    %42 = vector.load %arg5[%c0_17, %c0_18] : memref<1x128xf32, #tpu.memory_space<vmem>>, vector<1x128xf32>
    %43 = vector.broadcast %42 : vector<1x128xf32> to vector<8x128xf32>
    %44 = arith.mulf %41, %43 : vector<8x128xf32>
    %c0_19 = arith.constant 0 : index
    %c0_20 = arith.constant 0 : index
    %45 = vector.load %arg6[%c0_19, %c0_20] : memref<1x128xf32, #tpu.memory_space<vmem>>, vector<1x128xf32>
    %46 = vector.broadcast %45 : vector<1x128xf32> to vector<8x128xf32>
    %47 = arith.addf %44, %46 : vector<8x128xf32>
    %c0_21 = arith.constant 0 : index
    %c0_22 = arith.constant 0 : index
    %48 = vector.load %arg8[%c0_21, %c0_22] : memref<128x128xf32, #tpu.memory_space<vmem>>, vector<128x128xf32>
    %cst_23 = arith.constant dense<0.000000e+00> : vector<8x128xf32>
    %49 = tpu.matmul %47, %48, %cst_23 {dimension_numbers = #tpu.dot_dimension_numbers<[1], [0], [0], [1], [0, 0, 1, 1], [], []>} : vector<8x128xf32>, vector<128x128xf32>, vector<8x128xf32> -> vector<8x128xf32>
    %c0_24 = arith.constant 0 : index
    %c0_25 = arith.constant 0 : index
    %50 = vector.load %arg9[%c0_24, %c0_25] : memref<1x128xf32, #tpu.memory_space<vmem>>, vector<1x128xf32>
    %51 = vector.broadcast %50 : vector<1x128xf32> to vector<8x128xf32>
    %52 = arith.addf %49, %51 : vector<8x128xf32>
    %53 = tpu.iota {dimensions = array<i32: 1>} : vector<8x128xi32>
    %c6_i32 = arith.constant 6 : i32
    %54 = vector.broadcast %c6_i32 : i32 to vector<8x128xi32>
    %55 = arith.cmpi slt, %53, %54 : vector<8x128xi32>
    %cst_26 = arith.constant -1.000000e+30 : f32
    %56 = vector.broadcast %cst_26 : f32 to vector<8x128xf32>
    %57 = arith.select %55, %52, %56 : vector<8x128xi1>, vector<8x128xf32>
    %cst_27 = arith.constant dense<0xFF800000> : vector<8xf32>
    %58 = vector.multi_reduction <maximumf>, %57, %cst_27 [1] : vector<8x128xf32> to vector<8xf32>
    %59 = vector.shape_cast %58 : vector<8xf32> to vector<8x1xf32>
    %60 = vector.broadcast %59 : vector<8x1xf32> to vector<8x128xf32>
    %61 = arith.subf %52, %60 : vector<8x128xf32>
    %62 = math.exp %61 : vector<8x128xf32>
    %cst_28 = arith.constant 0.000000e+00 : f32
    %63 = vector.broadcast %cst_28 : f32 to vector<8x128xf32>
    %64 = arith.select %55, %62, %63 : vector<8x128xi1>, vector<8x128xf32>
    %cst_29 = arith.constant dense<0.000000e+00> : vector<8xf32>
    %65 = vector.multi_reduction <add>, %64, %cst_29 [1] : vector<8x128xf32> to vector<8xf32>
    %66 = vector.shape_cast %65 : vector<8xf32> to vector<8x1xf32>
    %67 = math.log %66 : vector<8x1xf32>
    %68 = vector.broadcast %67 : vector<8x1xf32> to vector<8x128xf32>
    %69 = arith.subf %61, %68 : vector<8x128xf32>
    %c0_30 = arith.constant 0 : index
    %c0_31 = arith.constant 0 : index
    %70 = vector.load %arg10[%c0_30, %c0_31] : memref<8x128xf32, #tpu.memory_space<vmem>>, vector<8x128xf32>
    tpu.vector_store %arg10[%c0_30, %c0_31], %69 {strides = array<i32>} : memref<8x128xf32, #tpu.memory_space<vmem>>, vector<8x128xf32>,
    return
  }
  func.func @transform_0(%arg0: i32) -> (i32, i32) {
    %c0_i32 = arith.constant 0 : i32
    %c0_i32_0 = arith.constant 0 : i32
    return %arg0, %c0_i32 : i32, i32
  }
  func.func @transform_1(%arg0: i32) -> (i32, i32) {
    %c0_i32 = arith.constant 0 : i32
    %c0_i32_0 = arith.constant 0 : i32
    %c0_i32_1 = arith.constant 0 : i32
    return %c0_i32, %c0_i32_0 : i32, i32
  }
  func.func @transform_2(%arg0: i32) -> (i32, i32) {
    %c0_i32 = arith.constant 0 : i32
    %c0_i32_0 = arith.constant 0 : i32
    %c0_i32_1 = arith.constant 0 : i32
    return %c0_i32, %c0_i32_0 : i32, i32
  }
  func.func @transform_3(%arg0: i32) -> (i32, i32) {
    %c0_i32 = arith.constant 0 : i32
    %c0_i32_0 = arith.constant 0 : i32
    %c0_i32_1 = arith.constant 0 : i32
    return %c0_i32, %c0_i32_0 : i32, i32
  }
  func.func @transform_4(%arg0: i32) -> (i32, i32) {
    %c0_i32 = arith.constant 0 : i32
    %c0_i32_0 = arith.constant 0 : i32
    %c0_i32_1 = arith.constant 0 : i32
    return %c0_i32, %c0_i32_0 : i32, i32
  }
  func.func @transform_5(%arg0: i32) -> (i32, i32) {
    %c0_i32 = arith.constant 0 : i32
    %c0_i32_0 = arith.constant 0 : i32
    %c0_i32_1 = arith.constant 0 : i32
    return %c0_i32, %c0_i32_0 : i32, i32
  }
  func.func @transform_6(%arg0: i32) -> (i32, i32) {
    %c0_i32 = arith.constant 0 : i32
    %c0_i32_0 = arith.constant 0 : i32
    %c0_i32_1 = arith.constant 0 : i32
    return %c0_i32, %c0_i32_0 : i32, i32
  }
  func.func @transform_7(%arg0: i32) -> (i32, i32) {
    %c0_i32 = arith.constant 0 : i32
    %c0_i32_0 = arith.constant 0 : i32
    %c0_i32_1 = arith.constant 0 : i32
    return %c0_i32, %c0_i32_0 : i32, i32
  }
  func.func @transform_8(%arg0: i32) -> (i32, i32) {
    %c0_i32 = arith.constant 0 : i32
    %c0_i32_0 = arith.constant 0 : i32
    %c0_i32_1 = arith.constant 0 : i32
    return %c0_i32, %c0_i32_0 : i32, i32
  }
  func.func @transform_9(%arg0: i32) -> (i32, i32) {
    %c0_i32 = arith.constant 0 : i32
    %c0_i32_0 = arith.constant 0 : i32
    return %arg0, %c0_i32 : i32, i32
  }
}

</mosaic_0001>

<bundles_post_ra>
// kernel: textcnn_forward.1
= control target key start
LH: loop header
LB: loop body
LE: loop exit
PB: predicated region body
PF: predicated region fallthrough
CT: control target
= control target key end

     0   :  { %s1451_s30 = smov 0   ;;  %s1960_s0 = inlined_call_operand.vmem [shape: bf16[512,32], index: 0, kind: input, shape index: {}]   ;;  %s1961_s1 = inlined_call_operand.vmem [shape: bf16[32,512], index: 1, kind: input, shape index: {}]   ;;  %s1962_s2 = inlined_call_operand.vmem [shape: f32[1,128], index: 2, kind: input, shape index: {}]   ;;  %s1963_s3 = inlined_call_operand.vmem [shape: s32[1,128], index: 3, kind: input, shape index: {}]   ;;  %s1964_s4 = inlined_call_operand.vmem [shape: f32[1,128], index: 4, kind: input, shape index: {}]   ;;  %s1965_s5 = inlined_call_operand.vmem [shape: f32[1,128], index: 5, kind: input, shape index: {}]   ;;  %s1966_s6 = inlined_call_operand.vmem [shape: f32[128,128], index: 6, kind: input, shape index: {}]   ;;  %s1967_s7 = inlined_call_operand.vmem [shape: f32[128,128], index: 7, kind: input, shape index: {}]   ;;  %s1968_s8 = inlined_call_operand.vmem [shape: f32[1,128], index: 8, kind: input, shape index: {}]   ;;  %s1969_s9 = inlined_call_operand.vmem [shape: f32[32,128], index: 9, kind: output, shape index: {}]  }
   0x1 LB: > { %s1457_s10 = sadd.s32 4294967295, %s1399_s30   ;;  %p1256_p0 = scmp.ge.s32.totalorder %s1399_s30, 1  ;;  %s1399_s30 = sphi %s1451_s30, %s19_s30  }
   0x2   : > { %p288_p1 = scmp.lt.s32.totalorder %s1399_s30, 5 }
   0x4   : > { %p289_p2 = pnand %p1256_p0, %p288_p1 }
   0x5   : > { %s1257_s24 = sshll.u32 (!%p289_p2), %s1457_s10, 4  ;;  %p329_p4 = scmp.lt.s32.totalorder (!%p289_p2), %s1457_s10, 3 }
   0x6   : > { %292 = sbr.rel (%p289_p2) target bundleno = 1000 (0x3e8), region = 56  ;;  %p324_p3 = scmp.lt.s32.totalorder (!%p289_p2), %s1257_s24, 63 }
   0xb   : > { %v1310_v0 = vld [vmem:[%s1961_s1 + $0x20] sm:$0xf]  ;;  %v1372_v1 = vld [vmem:[%s1961_s1 + $0x2c] sm:$0xf0]  ;;  %v1370_v2 = vld [vmem:[%s1961_s1 + $0x24] sm:$0xf]  ;;  %v675_v34 = vlaneseq }
   0xc   : > { %v1311_v3 = vor.u32 %v1372_v1, %v1310_v0  ;;  %v1312_v4 = vld [vmem:[%s1961_s1 + $0x30] sm:$0xf0]  ;;  %v1318_v5 = vld [vmem:[%s1961_s1 + $0x28] sm:$0xf]  ;;  %v1373_v6 = vld [vmem:[%s1961_s1 + $0x34] sm:$0xf0] }
   0xd   : > { %v1315_v7 = vor.u32 %v1370_v2, %v1312_v4  ;;  %v1319_v8 = vor.u32 %v1373_v6, %v1318_v5  ;;  %v1371_v9 = vld [vmem:[%s1961_s1 + $0x2c] sm:$0xf]  ;;  %v1320_v10 = vld [vmem:[%s1961_s1 + $0x38] sm:$0xf0]  ;;  %v1294_v11 = vld [vmem:[%s1961_s1] sm:$0xf] }
   0xe   : > { %469 = vmatpush.bf16.msra.mxu0 %v1311_v3  ;;  %v1323_v12 = vor.u32 %v1371_v9, %v1320_v10  ;;  %v1368_v13 = vld [vmem:[%s1961_s1 + $0xc] sm:$0xf0]  ;;  %v1366_v14 = vld [vmem:[%s1961_s1 + $0x4] sm:$0xf]  ;;  %v1296_v15 = vld [vmem:[%s1961_s1 + $0x10] sm:$0xf0] }
   0xf   : > { %518 = vmatpush.bf16.msra.mxu1 %v1315_v7  ;;  %567 = vmatpush.bf16.msra.mxu2 %v1319_v8  ;;  %v1295_v16 = vor.u32 %v1368_v13, %v1294_v11  ;;  %v1299_v17 = vor.u32 %v1366_v14, %v1296_v15  ;;  %v1302_v18 = vld [vmem:[%s1961_s1 + $0x8] sm:$0xf]  ;;  %v1369_v19 = vld [vmem:[%s1961_s1 + $0x14] sm:$0xf0]  ;;  %v1367_v20 = vld [vmem:[%s1961_s1 + $0xc] sm:$0xf] }
  0x10   : > { %616 = vmatpush.bf16.msra.mxu3 %v1323_v12  ;;  %v1303_v21 = vor.u32 %v1369_v19, %v1302_v18  ;;  %v1304_v22 = vld [vmem:[%s1961_s1 + $0x18] sm:$0xf0]  ;;  %s1975_s24 = smov (!%p324_p3, %s1257_s24), 63  ;;  %vm438_vm0 = vcmask 261120   ;;  %v1558_v35 = vshrl.u32 %v675_v34, 7  ;;  %v939_v53 = vld [vmem:[%s1966_s6 + $0x70] sm:$0xff] }
  0x11   : > { %v1307_v23 = vor.u32 %v1367_v20, %v1304_v22  ;;  %s1258_s25 = sshll.u32 %s1975_s24, 2  ;;  %v940_v52 = vld [vmem:[%s1966_s6 + $0x78] sm:$0xff]  ;;  %v1593_v61 = vld [vmem:[%s1962_s2] ss:$0 sm:$0xff]  ;;  %vm949_vm6 = vcmask 1041409   ;;  %vm951_vm7 = vcmask 1042434  }
  0x12   : > { %470 = vmatpush.bf16.msra.mxu0 %v1295_v16  ;;  %s1513_s28 = scalar_lea.vmem %s1960_s0, %s1258_s25  ;;  %vm677_vm1 = vcmp.lt.s32.totalorder %v1558_v35, 7  ;;  %vm726_vm2 = vcmp.lt.s32.totalorder %v1558_v35, 6  ;;  %vm775_vm3 = vcmp.lt.s32.totalorder %v1558_v35, 5  ;;  %v1383_v10 = vld [vmem:[%s1963_s3] ss:$0 sm:$0xff]  ;;  %v844_v11 = vadd.s32 8, %v1558_v35 }
  0x13   : > { %519 = vmatpush.bf16.msra.mxu1 %v1299_v17  ;;  %568 = vmatpush.bf16.msra.mxu2 %v1303_v21  ;;  %v1358_v24 = vld [vmem:[%s1513_s28] sm:$0xff]  ;;  %v1359_v25 = vld [vmem:[%s1513_s28 + $0x8] sm:$0xff]  ;;  %v1360_v26 = vld [vmem:[%s1513_s28 + $0x10] sm:$0xff]  ;;  %vm1608_vm4 = vcmp.lt.s32.totalorder %v1558_v35, %v1383_v10  ;;  %vm953_vm8 = vcmask 1043459   ;;  %vm955_vm9 = vcmask 1044484   ;;  %vm957_vm10 = vcmask 1045509  }
  0x14   : > { %617 = vmatpush.bf16.msra.mxu3 %v1307_v23  ;;  %v1361_v27 = vld [vmem:[%s1513_s28 + $0x18] sm:$0xff]  ;;  %v1362_v28 = vld [vmem:[%s1513_s28 + $0x20] sm:$0xff]  ;;  %v1363_v29 = vld [vmem:[%s1513_s28 + $0x28] sm:$0xff]  ;;  %vm1612_vm5 = vcmp.lt.s32.totalorder %v844_v11, %v1383_v10  ;;  %vm959_vm11 = vcmask 1046534   ;;  %vm961_vm12 = vcmask 1047559   ;;  %s1977_s10 = smov (!%p329_p4, %s1457_s10), 3 }
  0x15   : > { %1324 = vmatmul.msk.bf16.vlgmr.msra.gmra.mxu0 %vm438_vm0, %v1358_v24  ;;  %v1364_v30 = vld [vmem:[%s1513_s28 + $0x30] sm:$0xff]  ;;  %v1365_v31 = vld [vmem:[%s1513_s28 + $0x38] sm:$0xff]  ;;  %s1259_s27 = sshll.u32 %s1977_s10, 3 }
  0x16   : > { %1332 = vmatmul.msk.bf16.vlgmr.msra.gmra.mxu1 %vm438_vm0, %v1358_v24  ;;  %1340 = vmatmul.msk.bf16.vlgmr.msra.gmra.mxu2 %vm438_vm0, %v1358_v24  ;;  %s332_s11 = scalar_lea.vmem %s1969_s9, %s1259_s27 }
  0x17   : > { %1348 = vmatmul.msk.bf16.vlgmr.msra.gmra.mxu3 %vm438_vm0, %v1358_v24  ;;  %964 = vmatpush.msrb.mxu0 %v940_v52  ;;  %v938_v24 = vld [vmem:[%s1966_s6 + $0x68] sm:$0xff] }
  0x18   : > { %1040 = vmatpush.msrb.mxu1 %v940_v52 }
  0x19   : > { %965 = vmatpush.msrb.mxu0 %v939_v53 }
  0x1a   : > { %1041 = vmatpush.msrb.mxu1 %v939_v53 }
  0x1b   : > { %966 = vmatpush.msrb.mxu0 %v938_v24 }
  0x1c   : > { %1042 = vmatpush.msrb.mxu1 %v938_v24 }
  0x25   : > { %1325 = vmatmul.msk.bf16.gmra.mxu0 %vm438_vm0, %v1359_v25 }
  0x26   : > { %1333 = vmatmul.msk.bf16.gmra.mxu1 %vm438_vm0, %v1359_v25  ;;  %1341 = vmatmul.msk.bf16.gmra.mxu2 %vm438_vm0, %v1359_v25 }
  0x27   : > { %1349 = vmatmul.msk.bf16.gmra.mxu3 %vm438_vm0, %v1359_v25  ;;  %v937_v25 = vld [vmem:[%s1966_s6 + $0x60] sm:$0xff] }
  0x28   : > { %967 = vmatpush.msrb.mxu0 %v937_v25  ;;  %1043 = vmatpush.msrb.mxu1 %v937_v25 }
  0x35   : > { %1326 = vmatmul.msk.bf16.gmra.mxu0 %vm438_vm0, %v1360_v26 }
  0x36   : > { %1334 = vmatmul.msk.bf16.gmra.mxu1 %vm438_vm0, %v1360_v26  ;;  %1342 = vmatmul.msk.bf16.gmra.mxu2 %vm438_vm0, %v1360_v26 }
  0x37   : > { %1350 = vmatmul.msk.bf16.gmra.mxu3 %vm438_vm0, %v1360_v26 }
  0x45   : > { %1327 = vmatmul.msk.bf16.gmra.mxu0 %vm438_vm0, %v1361_v27 }
  0x46   : > { %1335 = vmatmul.msk.bf16.gmra.mxu1 %vm438_vm0, %v1361_v27  ;;  %1343 = vmatmul.msk.bf16.gmra.mxu2 %vm438_vm0, %v1361_v27 }
  0x47   : > { %1351 = vmatmul.msk.bf16.gmra.mxu3 %vm438_vm0, %v1361_v27 }
  0x55   : > { %1328 = vmatmul.msk.bf16.gmra.mxu0 %vm438_vm0, %v1362_v28 }
  0x56   : > { %1336 = vmatmul.msk.bf16.gmra.mxu1 %vm438_vm0, %v1362_v28  ;;  %1344 = vmatmul.msk.bf16.gmra.mxu2 %vm438_vm0, %v1362_v28 }
  0x57   : > { %1352 = vmatmul.msk.bf16.gmra.mxu3 %vm438_vm0, %v1362_v28 }
  0x65   : > { %1329 = vmatmul.msk.bf16.gmra.mxu0 %vm438_vm0, %v1363_v29 }
  0x66   : > { %1337 = vmatmul.msk.bf16.gmra.mxu1 %vm438_vm0, %v1363_v29  ;;  %1345 = vmatmul.msk.bf16.gmra.mxu2 %vm438_vm0, %v1363_v29 }
  0x67   : > { %1353 = vmatmul.msk.bf16.gmra.mxu3 %vm438_vm0, %v1363_v29 }
  0x75   : > { %1330 = vmatmul.msk.bf16.gmra.mxu0 %vm438_vm0, %v1364_v30 }
  0x76   : > { %1338 = vmatmul.msk.bf16.gmra.mxu1 %vm438_vm0, %v1364_v30  ;;  %1346 = vmatmul.msk.bf16.gmra.mxu2 %vm438_vm0, %v1364_v30 }
  0x77   : > { %1354 = vmatmul.msk.bf16.gmra.mxu3 %vm438_vm0, %v1364_v30 }
  0x85   : > { %1331 = vmatmul.msk.bf16.gmra.mxu0 %vm438_vm0, %v1365_v31 }
  0x86   : > { %1339 = vmatmul.msk.bf16.gmra.mxu1 %vm438_vm0, %v1365_v31  ;;  %1347 = vmatmul.msk.bf16.gmra.mxu2 %vm438_vm0, %v1365_v31 }
  0x87   : > { %1355 = vmatmul.msk.bf16.gmra.mxu3 %vm438_vm0, %v1365_v31 }
  0x92   : > { %v472_v32 = vpop.f32.mrf.mxu0 }
  0x93   : > { %v1555_v33 = vpop.f32.mrf.mxu1 }
  0x94   : > { %v659_v40 = vrot.slane %v1555_v33, 1 }
  0x99   : > { %v1560_v36 = vpop.f32.mrf.mxu2 }
  0x9a   : > { %v1562_v37 = vpop.f32.mrf.mxu3  ;;  %v474_v38 = vpop.f32.mrf.mxu0  ;;  %v710_v46 = vrot.slane %v1560_v36, 2 }
  0x9b   : > { %v523_v39 = vpop.f32.mrf.mxu1  ;;  %v759_v47 = vrot.slane %v1562_v37, 3 }
  0x9c   : > { %v660_v41 = vrot.slane %v523_v39, 1 }
  0x9e   : > { %v692_v42 = vsel %vm677_vm1, %v659_v40, %v660_v41 }
  0x9f   : > { %v694_v43 = vadd.f32 %v692_v42, %v472_v32 }
  0xa1   : > { %v572_v44 = vpop.f32.mrf.mxu2 }
  0xa2   : > { %v621_v45 = vpop.f32.mrf.mxu3  ;;  %v711_v48 = vrot.slane %v572_v44, 2  ;;  %v477_v50 = vpop.f32.mrf.mxu0 }
  0xa3   : > { %v760_v49 = vrot.slane %v621_v45, 3  ;;  %v526_v51 = vpop.f32.mrf.mxu1 }
  0xa4   : > { %v661_v54 = vrot.slane %v526_v51, 1  ;;  %v741_v55 = vsel %vm726_vm2, %v710_v46, %v711_v48 }
  0xa5   : > { %v790_v56 = vsel %vm775_vm3, %v759_v47, %v760_v49  ;;  %v743_v57 = vadd.f32 %v741_v55, %v694_v43 }
  0xa6   : > { %v691_v58 = vsel %vm677_vm1, %v660_v41, %v661_v54 }
  0xa7   : > { %v695_v59 = vadd.f32 %v691_v58, %v474_v38  ;;  %v792_v60 = vadd.f32 %v790_v56, %v743_v57 }
  0xa9   : > { %v575_v62 = vpop.f32.mrf.mxu2  ;;  %v812_v7 = vadd.f32 %v1593_v61, %v792_v60  ;;  %v935_v60 = vld [vmem:[%s1966_s6 + $0x50] sm:$0xff] }
  0xaa   : > { %v624_v63 = vpop.f32.mrf.mxu3  ;;  %v712_v0 = vrot.slane %v575_v62, 2  ;;  %v479_v2 = vpop.f32.mrf.mxu0 }
  0xab   : > { %v761_v1 = vrot.slane %v624_v63, 3  ;;  %v528_v3 = vpop.f32.mrf.mxu1  ;;  %v828_v14 = vmax.f32 %v812_v7, 0.0 }
  0xac   : > { %v662_v4 = vrot.slane %v528_v3, 1  ;;  %v740_v5 = vsel %vm726_vm2, %v711_v48, %v712_v0 }
  0xad   : > { %v789_v6 = vsel %vm775_vm3, %v760_v49, %v761_v1  ;;  %v744_v8 = vadd.f32 %v740_v5, %v695_v59  ;;  %v853_v30 = vsel %vm1608_vm4, %v828_v14, 0.0  ;;  %v936_v59 = vld [vmem:[%s1966_s6 + $0x58] sm:$0xff] }
  0xae   : > { %v690_v9 = vsel %vm677_vm1, %v661_v54, %v662_v4  ;;  %968 = vmatpush.msrb.mxu0 %v936_v59  ;;  %1044 = vmatpush.msrb.mxu1 %v936_v59 }
  0xaf   : > { %v696_v12 = vadd.f32 %v690_v9, %v477_v50  ;;  %v793_v13 = vadd.f32 %v789_v6, %v744_v8 }
  0xb0   : > { %969 = vmatpush.msrb.mxu0 %v935_v60  ;;  %1045 = vmatpush.msrb.mxu1 %v935_v60 }
  0xb1   : > { %v813_v15 = vadd.f32 %v1593_v61, %v793_v13  ;;  %v577_v16 = vpop.f32.mrf.mxu2 }
  0xb2   : > { %v626_v17 = vpop.f32.mrf.mxu3  ;;  %v713_v20 = vrot.slane %v577_v16, 2  ;;  %v482_v22 = vpop.f32.mrf.mxu0 }
  0xb3   : > { %v762_v21 = vrot.slane %v626_v17, 3  ;;  %v531_v23 = vpop.f32.mrf.mxu1  ;;  %v829_v26 = vmax.f32 %v813_v15, 0.0 }
  0xb4   : > { %v663_v27 = vrot.slane %v531_v23, 1  ;;  %v739_v28 = vsel %vm726_vm2, %v712_v0, %v713_v20 }
  0xb5   : > { %v788_v29 = vsel %vm775_vm3, %v761_v1, %v762_v21  ;;  %v854_v31 = vsel %vm1612_vm5, %v829_v26, 0.0  ;;  %v745_v32 = vadd.f32 %v739_v28, %v696_v12 }
  0xb6   : > { %v689_v38 = vsel %vm677_vm1, %v662_v4, %v663_v27  ;;  %v1632_v39 = vmax.f32 %v853_v30, %v854_v31 }
  0xb7   : > { %v697_v41 = vadd.f32 %v689_v38, %v479_v2  ;;  %v794_v42 = vadd.f32 %v788_v29, %v745_v32  ;;  %v934_v32 = vld [vmem:[%s1966_s6 + $0x48] sm:$0xff]  ;;  %v933_v38 = vld [vmem:[%s1966_s6 + $0x40] sm:$0xff] }
  0xb8   : > { %970 = vmatpush.msrb.mxu0 %v934_v32  ;;  %1046 = vmatpush.msrb.mxu1 %v934_v32 }
  0xb9   : > { %v580_v43 = vpop.f32.mrf.mxu2  ;;  %v814_v54 = vadd.f32 %v1593_v61, %v794_v42 }
  0xba   : > { %v629_v44 = vpop.f32.mrf.mxu3  ;;  %v714_v45 = vrot.slane %v580_v43, 2  ;;  %v484_v49 = vpop.f32.mrf.mxu0  ;;  %971 = vmatpush.msrb.mxu0 %v933_v38  ;;  %1047 = vmatpush.msrb.mxu1 %v933_v38 }
  0xbb   : > { %v763_v48 = vrot.slane %v629_v44, 3  ;;  %v533_v50 = vpop.f32.mrf.mxu1  ;;  %v830_v62 = vmax.f32 %v814_v54, 0.0 }
  0xbc   : > { %v664_v51 = vrot.slane %v533_v50, 1  ;;  %v738_v52 = vsel %vm726_vm2, %v713_v20, %v714_v45 }
  0xbd   : > { %v787_v53 = vsel %vm775_vm3, %v762_v21, %v763_v48  ;;  %v746_v55 = vadd.f32 %v738_v52, %v697_v41  ;;  %v855_v10 = vsel %vm1608_vm4, %v830_v62, 0.0 }
  0xbe   : > { %v688_v56 = vsel %vm677_vm1, %v663_v27, %v664_v51 }
  0xbf   : > { %v698_v57 = vadd.f32 %v688_v56, %v482_v22  ;;  %v795_v58 = vadd.f32 %v787_v53, %v746_v55 }
  0xc1   : > { %v815_v63 = vadd.f32 %v1593_v61, %v795_v58  ;;  %v582_v0 = vpop.f32.mrf.mxu2 }
  0xc2   : > { %v631_v1 = vpop.f32.mrf.mxu3  ;;  %v715_v2 = vrot.slane %v582_v0, 2  ;;  %v487_v4 = vpop.f32.mrf.mxu0 }
  0xc3   : > { %v764_v3 = vrot.slane %v631_v1, 3  ;;  %v536_v5 = vpop.f32.mrf.mxu1  ;;  %v831_v6 = vmax.f32 %v815_v63, 0.0  ;;  %v932_v1 = vld [vmem:[%s1966_s6 + $0x38] sm:$0xff] }
  0xc4   : > { %v665_v7 = vrot.slane %v536_v5, 1  ;;  %v737_v8 = vsel %vm726_vm2, %v714_v45, %v715_v2  ;;  %972 = vmatpush.msrb.mxu0 %v932_v1  ;;  %1048 = vmatpush.msrb.mxu1 %v932_v1 }
  0xc5   : > { %v786_v9 = vsel %vm775_vm3, %v763_v48, %v764_v3  ;;  %v856_v11 = vsel %vm1612_vm5, %v831_v6, 0.0  ;;  %v747_v12 = vadd.f32 %v737_v8, %v698_v57 }
  0xc6   : > { %v687_v13 = vsel %vm677_vm1, %v664_v51, %v665_v7  ;;  %v1658_v14 = vmax.f32 %v855_v10, %v856_v11  ;;  %v930_v11 = vld [vmem:[%s1966_s6 + $0x28] sm:$0xff] }
  0xc7   : > { %v699_v15 = vadd.f32 %v687_v13, %v484_v49  ;;  %v796_v16 = vadd.f32 %v786_v9, %v747_v12  ;;  %v929_v12 = vld [vmem:[%s1966_s6 + $0x20] sm:$0xff] }
  0xc9   : > { %v585_v17 = vpop.f32.mrf.mxu2  ;;  %v816_v28 = vadd.f32 %v1593_v61, %v796_v16 }
  0xca   : > { %v634_v20 = vpop.f32.mrf.mxu3  ;;  %v716_v21 = vrot.slane %v585_v17, 2  ;;  %v1660_v23 = vpop.f32.mrf.mxu0 }
  0xcb   : > { %v765_v22 = vrot.slane %v634_v20, 3  ;;  %v1662_v24 = vpop.f32.mrf.mxu1  ;;  %v832_v42 = vmax.f32 %v816_v28, 0.0 }
  0xcc   : > { %v666_v25 = vrot.slane %v1662_v24, 1  ;;  %v736_v26 = vsel %vm726_vm2, %v715_v2, %v716_v21  ;;  %v931_v2 = vld [vmem:[%s1966_s6 + $0x30] sm:$0xff] }
  0xcd   : > { %v785_v27 = vsel %vm775_vm3, %v764_v3, %v765_v22  ;;  %v748_v29 = vadd.f32 %v736_v26, %v699_v15  ;;  %v857_v54 = vsel %vm1608_vm4, %v832_v42, 0.0  ;;  %973 = vmatpush.msrb.mxu0 %v931_v2  ;;  %1049 = vmatpush.msrb.mxu1 %v931_v2 }
  0xce   : > { %v686_v30 = vsel %vm677_vm1, %v665_v7, %v666_v25 }
  0xcf   : > { %v700_v31 = vadd.f32 %v686_v30, %v487_v4  ;;  %v797_v41 = vadd.f32 %v785_v27, %v748_v29  ;;  %974 = vmatpush.msrb.mxu0 %v930_v11  ;;  %1050 = vmatpush.msrb.mxu1 %v930_v11 }
  0xd1   : > { %v817_v43 = vadd.f32 %v1593_v61, %v797_v41  ;;  %v587_v44 = vpop.f32.mrf.mxu2  ;;  %975 = vmatpush.msrb.mxu0 %v929_v12  ;;  %1051 = vmatpush.msrb.mxu1 %v929_v12 }
  0xd2   : > { %v1681_v45 = vpop.f32.mrf.mxu3  ;;  %v717_v48 = vrot.slane %v587_v44, 2  ;;  %v492_v50 = vpop.f32.mrf.mxu0 }
  0xd3   : > { %v766_v49 = vrot.slane %v1681_v45, 3  ;;  %v541_v51 = vpop.f32.mrf.mxu1  ;;  %v833_v52 = vmax.f32 %v817_v43, 0.0 }
  0xd4   : > { %v735_v53 = vsel %vm726_vm2, %v716_v21, %v717_v48  ;;  %v667_v13 = vrot.slane %v541_v51, 1 }
  0xd5   : > { %v858_v55 = vsel %vm1612_vm5, %v833_v52, 0.0  ;;  %v749_v56 = vadd.f32 %v735_v53, %v700_v31  ;;  %v784_v58 = vsel %vm775_vm3, %v765_v22, %v766_v49 }
  0xd6   : > { %v1690_v57 = vmax.f32 %v857_v54, %v858_v55  ;;  %v685_v27 = vsel %vm677_vm1, %v666_v25, %v667_v13  ;;  %v928_v54 = vld [vmem:[%s1966_s6 + $0x18] sm:$0xff] }
  0xd7   : > { %v1696_v59 = vadd.f32 %v784_v58, %v749_v56  ;;  %v701_v43 = vadd.f32 %v685_v27, %v1660_v23  ;;  %976 = vmatpush.msrb.mxu0 %v928_v54  ;;  %1052 = vmatpush.msrb.mxu1 %v928_v54  ;;  %v925_v27 = vld [vmem:[%s1966_s6] sm:$0xff] }
  0xd9   : > { %v590_v60 = vpop.f32.mrf.mxu2 }
  0xda   : > { %v1698_v62 = vpop.f32.mrf.mxu3  ;;  %v494_v63 = vpop.f32.mrf.mxu0  ;;  %v718_v20 = vrot.slane %v590_v60, 2 }
  0xdb   : > { %v543_v0 = vpop.f32.mrf.mxu1  ;;  %v767_v25 = vrot.slane %v1698_v62, 3 }
  0xdc   : > { %v668_v21 = vrot.slane %v543_v0, 1  ;;  %v734_v38 = vsel %vm726_vm2, %v717_v48, %v718_v20 }
  0xdd   : > { %v750_v55 = vadd.f32 %v734_v38, %v701_v43 }
  0xde   : > { %v684_v41 = vsel %vm677_vm1, %v667_v13, %v668_v21 }
  0xdf   : > { %v702_v23 = vadd.f32 %v684_v41, %v492_v50 }
  0xe1   : > { %v592_v3 = vpop.f32.mrf.mxu2 }
  0xe2   : > { %v1706_v4 = vpop.f32.mrf.mxu3  ;;  %v497_v5 = vpop.f32.mrf.mxu0  ;;  %v719_v28 = vrot.slane %v592_v3, 2  ;;  %v783_v3 = vsel %vm775_vm3, %v766_v49, %v767_v25 }
  0xe3   : > { %v546_v6 = vpop.f32.mrf.mxu1  ;;  %v768_v62 = vrot.slane %v1706_v4, 3  ;;  %v799_v12 = vadd.f32 %v783_v3, %v750_v55 }
  0xe4   : > { %v669_v15 = vrot.slane %v546_v6, 1  ;;  %v733_v51 = vsel %vm726_vm2, %v718_v20, %v719_v28 }
  0xe5   : > { %v751_v6 = vadd.f32 %v733_v51, %v702_v23  ;;  %v782_v45 = vsel %vm775_vm3, %v767_v25, %v768_v62 }
  0xe6   : > { %v683_v29 = vsel %vm677_vm1, %v668_v21, %v669_v15 }
  0xe7   : > { %v703_v44 = vadd.f32 %v683_v29, %v494_v63  ;;  %v800_v20 = vadd.f32 %v782_v45, %v751_v6 }
  0xe9   : > { %v595_v7 = vpop.f32.mrf.mxu2 }
  0xea   : > { %v1708_v8 = vpop.f32.mrf.mxu3  ;;  %v499_v9 = vpop.f32.mrf.mxu0  ;;  %v720_v22 = vrot.slane %v595_v7, 2 }
  0xeb   : > { %v548_v10 = vpop.f32.mrf.mxu1  ;;  %v769_v52 = vrot.slane %v1708_v8, 3 }
  0xec   : > { %v670_v30 = vrot.slane %v548_v10, 1  ;;  %v732_v42 = vsel %vm726_vm2, %v719_v28, %v720_v22  ;;  %v819_v28 = vadd.f32 %v1593_v61, %v799_v12 }
  0xed   : > { %v752_v56 = vadd.f32 %v732_v42, %v703_v44  ;;  %v781_v8 = vsel %vm775_vm3, %v768_v62, %v769_v52  ;;  %v818_v42 = vadd.f32 %v1593_v61, %v1696_v59 }
  0xee   : > { %v682_v48 = vsel %vm677_vm1, %v669_v15, %v670_v30 }
  0xef   : > { %v704_v50 = vadd.f32 %v682_v48, %v497_v5  ;;  %v801_v13 = vadd.f32 %v781_v8, %v752_v56  ;;  %v834_v59 = vmax.f32 %v818_v42, 0.0 }
  0xf1   : > { %v597_v16 = vpop.f32.mrf.mxu2  ;;  %v821_v29 = vadd.f32 %v1593_v61, %v801_v13 }
  0xf2   : > { %v646_v17 = vpop.f32.mrf.mxu3  ;;  %v502_v31 = vpop.f32.mrf.mxu0  ;;  %v721_v24 = vrot.slane %v597_v16, 2 }
  0xf3   : > { %v551_v26 = vpop.f32.mrf.mxu1  ;;  %v770_v10 = vrot.slane %v646_v17, 3  ;;  %v926_v17 = vld [vmem:[%s1966_s6 + $0x8] sm:$0xff]  ;;  %v837_v54 = vmax.f32 %v821_v29, 0.0 }
  0xf4   : > { %v671_v32 = vrot.slane %v551_v26, 1  ;;  %v731_v63 = vsel %vm726_vm2, %v720_v22, %v721_v24 }
  0xf5   : > { %v753_v15 = vadd.f32 %v731_v63, %v704_v50  ;;  %v780_v22 = vsel %vm775_vm3, %v769_v52, %v770_v10 }
  0xf6   : > { %v681_v53 = vsel %vm677_vm1, %v670_v30, %v671_v32 }
  0xf7   : > { %v705_v7 = vadd.f32 %v681_v53, %v499_v9  ;;  %v927_v9 = vld [vmem:[%s1966_s6 + $0x10] sm:$0xff]  ;;  %v802_v30 = vadd.f32 %v780_v22, %v753_v15  ;;  %v835_v53 = vmax.f32 %v819_v28, 0.0 }
  0xf8   : > { %977 = vmatpush.msrb.mxu0 %v927_v9  ;;  %1053 = vmatpush.msrb.mxu1 %v927_v9  ;;  %v870_v9 = vrot.slane %v1632_v39, 4 }
  0xf9   : > { %v600_v58 = vpop.f32.mrf.mxu2  ;;  %v822_v55 = vadd.f32 %v1593_v61, %v802_v30  ;;  %v860_v63 = vsel %vm1612_vm5, %v835_v53, 0.0 }
  0xfa   : > { %v649_v60 = vpop.f32.mrf.mxu3  ;;  %v722_v0 = vrot.slane %v600_v58, 2  ;;  %v504_v5 = vpop.f32.mrf.mxu0  ;;  %978 = vmatpush.msrb.mxu0 %v926_v17  ;;  %1054 = vmatpush.msrb.mxu1 %v926_v17  ;;  %v871_v42 = vmax.f32 %v1632_v39, %v870_v9 }
  0xfb   : > { %v771_v1 = vrot.slane %v649_v60, 3  ;;  %v553_v2 = vpop.f32.mrf.mxu1 }
  0xfc   : > { %v730_v4 = vsel %vm726_vm2, %v721_v24, %v722_v0  ;;  %v672_v11 = vrot.slane %v553_v2, 1  ;;  %979 = vmatpush.msrb.mxu0 %v925_v27  ;;  %1055 = vmatpush.msrb.mxu1 %v925_v27  ;;  %v838_v2 = vmax.f32 %v822_v55, 0.0  ;;  %v884_v27 = vrot.slane %v1690_v57, 4 }
  0xfd   : > { %v754_v16 = vadd.f32 %v730_v4, %v705_v7  ;;  %v779_v49 = vsel %vm775_vm3, %v770_v10, %v771_v1  ;;  %v877_v7 = vrot.slane %v1658_v14, 4 }
  0xfe   : > { %v680_v26 = vsel %vm677_vm1, %v671_v32, %v672_v11  ;;  %v820_v32 = vadd.f32 %v1593_v61, %v800_v20  ;;  %v863_v17 = vsel %vm1608_vm4, %v838_v2, 0.0 }
  0xff   : > { %v803_v21 = vadd.f32 %v779_v49, %v754_v16  ;;  %v706_v44 = vadd.f32 %v680_v26, %v502_v31  ;;  %v878_v22 = vmax.f32 %v1658_v14, %v877_v7 }
 0x100   : > { %v836_v56 = vmax.f32 %v820_v32, 0.0 }
 0x101   : > { %v602_v38 = vpop.f32.mrf.mxu2  ;;  %v823_v25 = vadd.f32 %v1593_v61, %v803_v21 }
 0x102   : > { %v651_v41 = vpop.f32.mrf.mxu3  ;;  %v723_v24 = vrot.slane %v602_v38, 2  ;;  %v507_v62 = vpop.f32.mrf.mxu0 }
 0x103   : > { %v556_v43 = vpop.f32.mrf.mxu1  ;;  %v772_v52 = vrot.slane %v651_v41, 3  ;;  %v839_v58 = vmax.f32 %v823_v25, 0.0  ;;  %v879_v25 = vrot.slane %v878_v22, 2 }
 0x104   : > { %v729_v51 = vsel %vm726_vm2, %v722_v0, %v723_v24  ;;  %v673_v48 = vrot.slane %v556_v43, 1  ;;  %v862_v0 = vsel %vm1612_vm5, %v837_v54, 0.0  ;;  %v885_v54 = vmax.f32 %v1690_v57, %v884_v27 }
 0x105   : > { %v755_v23 = vadd.f32 %v729_v51, %v706_v44  ;;  %v778_v60 = vsel %vm775_vm3, %v771_v1, %v772_v52  ;;  %v859_v1 = vsel %vm1608_vm4, %v834_v59, 0.0  ;;  %v864_v12 = vsel %vm1612_vm5, %v839_v58, 0.0 }
 0x106   : > { %v679_v31 = vsel %vm677_vm1, %v672_v11, %v673_v48  ;;  %v861_v11 = vsel %vm1608_vm4, %v836_v56, 0.0  ;;  %v890_v15 = vmax.f32 %v859_v1, %v860_v63  ;;  %v904_v26 = vmax.f32 %v863_v17, %v864_v12 }
 0x107   : > { %v804_v3 = vadd.f32 %v778_v60, %v755_v23  ;;  %v707_v13 = vadd.f32 %v679_v31, %v504_v5  ;;  %v897_v16 = vmax.f32 %v861_v11, %v862_v0  ;;  %v886_v0 = vrot.slane %v885_v54, 2 }
 0x108   : > { %v891_v29 = vrot.slane %v890_v15, 4  ;;  %v905_v44 = vrot.slane %v904_v26, 4  ;;  %v880_v1 = vmax.f32 %v878_v22, %v879_v25 }
 0x109   : > { %v605_v6 = vpop.f32.mrf.mxu2  ;;  %v824_v20 = vadd.f32 %v1593_v61, %v804_v3  ;;  %v898_v30 = vrot.slane %v897_v16, 4  ;;  %v872_v3 = vrot.slane %v871_v42, 2 }
 0x10a   : > { %v654_v50 = vpop.f32.mrf.mxu3  ;;  %v724_v8 = vrot.slane %v605_v6, 2  ;;  %v509_v51 = vpop.f32.mrf.mxu0  ;;  %v892_v23 = vmax.f32 %v890_v15, %v891_v29  ;;  %v881_v9 = vrot.slane %v880_v1, 1 }
 0x10b   : > { %v773_v10 = vrot.slane %v654_v50, 3  ;;  %v558_v4 = vpop.f32.mrf.mxu1  ;;  %v840_v14 = vmax.f32 %v824_v20, 0.0  ;;  %v899_v59 = vmax.f32 %v897_v16, %v898_v30  ;;  %v873_v15 = vmax.f32 %v871_v42, %v872_v3 }
 0x10c   : > { %v728_v45 = vsel %vm726_vm2, %v723_v24, %v724_v8  ;;  %v674_v49 = vrot.slane %v558_v4, 1  ;;  %v893_v6 = vrot.slane %v892_v23, 2 }
 0x10d   : > { %v756_v21 = vadd.f32 %v728_v45, %v707_v13  ;;  %v777_v5 = vsel %vm775_vm3, %v772_v52, %v773_v10  ;;  %v865_v56 = vsel %vm1608_vm4, %v840_v14, 0.0  ;;  %v900_v7 = vrot.slane %v899_v59, 2 }
 0x10e   : > { %v678_v38 = vsel %vm677_vm1, %v673_v48, %v674_v49  ;;  %v693_v41 = vsel %vm677_vm1, %v674_v49, %v659_v40  ;;  %v894_v35 = vmax.f32 %v892_v23, %v893_v6  ;;  %v874_v22 = vrot.slane %v873_v15, 1  ;;  %v1135_v23 = vld [vmem:[%s1967_s7 + $0x78] sm:$0xff] }
 0x10f   : > { %v805_v28 = vadd.f32 %v777_v5, %v756_v21  ;;  %v708_v55 = vadd.f32 %v678_v38, %v507_v62  ;;  %v709_v33 = vadd.f32 %v693_v41, %v509_v51  ;;  %v906_v62 = vmax.f32 %v904_v26, %v905_v44  ;;  %1163 = vmatpush.msrb.mxu2 %v1135_v23 }
 0x110   : > { %v901_v49 = vmax.f32 %v899_v59, %v900_v7  ;;  %v895_v26 = vrot.slane %v894_v35, 1  ;;  %v875_v18 = vmax.f32 %v873_v15, %v874_v22  ;;  %v1134_v59 = vld [vmem:[%s1967_s7 + $0x70] sm:$0xff] }
 0x111   : > { %v825_v24 = vadd.f32 %v1593_v61, %v805_v28  ;;  %v607_v43 = vpop.f32.mrf.mxu2  ;;  %v907_v11 = vrot.slane %v906_v62, 2  ;;  %v882_v28 = vmax.f32 %v880_v1, %v881_v9  ;;  %1164 = vmatpush.msrb.mxu2 %v1134_v59 }
 0x112   : > { %v656_v32 = vpop.f32.mrf.mxu3  ;;  %v725_v52 = vrot.slane %v607_v43, 2  ;;  %v902_v27 = vrot.slane %v901_v49, 1  ;;  %v896_v42 = vmax.f32 %v894_v35, %v895_v26 }
 0x113   : > { %v774_v53 = vrot.slane %v656_v32, 3  ;;  %v841_v48 = vmax.f32 %v825_v24, 0.0  ;;  %v908_v20 = vmax.f32 %v906_v62, %v907_v11  ;;  %v950_v32 = vsel %vm949_vm6, %v882_v28, %v875_v18 }
 0x114   : > { %v727_v40 = vsel %vm726_vm2, %v724_v8, %v725_v52  ;;  %v742_v39 = vsel %vm726_vm2, %v725_v52, %v710_v46  ;;  %v903_v14 = vmax.f32 %v901_v49, %v902_v27 }
 0x115   : > { %v866_v58 = vsel %vm1612_vm5, %v841_v48, 0.0  ;;  %v757_v57 = vadd.f32 %v727_v40, %v708_v55  ;;  %v758_v60 = vadd.f32 %v742_v39, %v709_v33  ;;  %v776_v63 = vsel %vm775_vm3, %v773_v10, %v774_v53  ;;  %v1133_v40 = vld [vmem:[%s1967_s7 + $0x68] sm:$0xff]  ;;  %v1132_v39 = vld [vmem:[%s1967_s7 + $0x60] sm:$0xff] }
 0x116   : > { %v911_v31 = vmax.f32 %v865_v56, %v866_v58  ;;  %v791_v36 = vsel %vm775_vm3, %v774_v53, %v759_v47  ;;  %v887_v10 = vmax.f32 %v885_v54, %v886_v0  ;;  %v909_v29 = vrot.slane %v908_v20, 1  ;;  %1165 = vmatpush.msrb.mxu2 %v1133_v40  ;;  %v1131_v56 = vld [vmem:[%s1967_s7 + $0x58] sm:$0xff]  ;;  %v1130_v58 = vld [vmem:[%s1967_s7 + $0x50] sm:$0xff]  ;;  %v1384_v40 = vld [vmem:[%s1964_s4] ss:$0 sm:$0xff] }
 0x117   : > { %v806_v46 = vadd.f32 %v776_v63, %v757_v57  ;;  %v807_v2 = vadd.f32 %v791_v36, %v758_v60  ;;  %v1129_v57 = vld [vmem:[%s1967_s7 + $0x48] sm:$0xff]  ;;  %v1128_v60 = vld [vmem:[%s1967_s7 + $0x40] sm:$0xff]  ;;  %v1126_v36 = vld [vmem:[%s1967_s7 + $0x30] sm:$0xff] }
 0x118   : > { %v912_v50 = vrot.slane %v911_v31, 4  ;;  %v910_v24 = vmax.f32 %v908_v20, %v909_v29  ;;  %1166 = vmatpush.msrb.mxu2 %v1132_v39 }
 0x119   : > { %v826_v8 = vadd.f32 %v1593_v61, %v806_v46  ;;  %v827_v4 = vadd.f32 %v1593_v61, %v807_v2  ;;  %v888_v61 = vrot.slane %v887_v10, 1 }
 0x11a   : > { %v913_v12 = vmax.f32 %v911_v31, %v912_v50  ;;  %1167 = vmatpush.msrb.mxu2 %v1131_v56  ;;  %v1127_v31 = vld [vmem:[%s1967_s7 + $0x38] sm:$0xff] }
 0x11b   : > { %v842_v13 = vmax.f32 %v826_v8, 0.0  ;;  %v843_v37 = vmax.f32 %v827_v4, 0.0  ;;  %v889_v38 = vmax.f32 %v887_v10, %v888_v61  ;;  %v1125_v4 = vld [vmem:[%s1967_s7 + $0x28] sm:$0xff] }
 0x11c   : > { %v914_v47 = vrot.slane %v913_v12, 2  ;;  %1168 = vmatpush.msrb.mxu2 %v1130_v58 }
 0x11d   : > { %v867_v16 = vsel %vm1608_vm4, %v842_v13, 0.0  ;;  %v868_v45 = vsel %vm1612_vm5, %v843_v37, 0.0  ;;  %v952_v44 = vsel %vm951_vm7, %v889_v38, %v950_v32  ;;  %v1121_v32 = vld [vmem:[%s1967_s7 + $0x8] sm:$0xff] }
 0x11e   : > { %v918_v17 = vmax.f32 %v867_v16, %v868_v45  ;;  %v915_v21 = vmax.f32 %v913_v12, %v914_v47  ;;  %v954_v52 = vsel %vm953_vm8, %v896_v42, %v952_v44  ;;  %1169 = vmatpush.msrb.mxu2 %v1129_v57 }
 0x11f   : > { %v956_v53 = vsel %vm955_vm9, %v903_v14, %v954_v52 }
 0x120   : > { %v919_v5 = vrot.slane %v918_v17, 4  ;;  %v916_v41 = vrot.slane %v915_v21, 1  ;;  %v958_v48 = vsel %vm957_vm10, %v910_v24, %v956_v53  ;;  %1170 = vmatpush.msrb.mxu2 %v1128_v60 }
 0x122   : > { %v920_v30 = vmax.f32 %v918_v17, %v919_v5  ;;  %v917_v25 = vmax.f32 %v915_v21, %v916_v41  ;;  %1171 = vmatpush.msrb.mxu2 %v1127_v31 }
 0x124   : > { %v921_v19 = vrot.slane %v920_v30, 2  ;;  %v960_v55 = vsel %vm959_vm11, %v917_v25, %v958_v48  ;;  %1172 = vmatpush.msrb.mxu2 %v1126_v36 }
 0x126   : > { %v922_v43 = vmax.f32 %v920_v30, %v921_v19  ;;  %1173 = vmatpush.msrb.mxu2 %v1125_v4 }
 0x128   : > { %v923_v51 = vrot.slane %v922_v43, 1 }
 0x12a   : > { %v924_v54 = vmax.f32 %v922_v43, %v923_v51  ;;  %v1122_v43 = vld [vmem:[%s1967_s7 + $0x10] sm:$0xff] }
 0x12c   : > { %v962_v33 = vsel %vm961_vm12, %v924_v54, %v960_v55 }
 0x12d   : > { %980 = vmatmul.f32.vlgmr.msrb.gmra.mxu0 %v962_v33 }
 0x1aa   : > { %v981_v62 = vpop.f32.mrf.mxu0 }
 0x1ab   : > { %v984_v63 = vmul.f32 0.0625, %v981_v62 }
 0x1ad   : > { %v986_v0 = vrot.slane %v984_v63, 1  ;;  %v987_v46 = vrot.slane %v984_v63, 2  ;;  %v988_v2 = vrot.slane %v984_v63, 3  ;;  %v989_v3 = vrot.slane %v984_v63, 4 }
 0x1ae   : > { %v990_v6 = vrot.slane %v984_v63, 5  ;;  %v991_v50 = vrot.slane %v984_v63, 6  ;;  %v992_v7 = vrot.slane %v984_v63, 7  ;;  %v1870_v8 = vsub.f32 %v875_v18, %v984_v63 }
 0x1af   : > { %v1875_v1 = vsub.f32 %v882_v28, %v986_v0  ;;  %v1877_v11 = vsub.f32 %v889_v38, %v987_v46  ;;  %v1879_v12 = vsub.f32 %v896_v42, %v988_v2  ;;  %v1881_v10 = vsub.f32 %v903_v14, %v989_v3  ;;  %v1124_v14 = vld [vmem:[%s1967_s7 + $0x20] sm:$0xff] }
 0x1b0   : > { %v1883_v13 = vsub.f32 %v910_v24, %v990_v6  ;;  %v1885_v37 = vsub.f32 %v917_v25, %v991_v50  ;;  %v1887_v15 = vsub.f32 %v924_v54, %v992_v7  ;;  %v1009_v49 = vmul.f32 %v1870_v8, %v1870_v8  ;;  %v1123_v24 = vld [vmem:[%s1967_s7 + $0x18] sm:$0xff]  ;;  %1174 = vmatpush.msrb.mxu2 %v1124_v14  ;;  %v1120_v25 = vld [vmem:[%s1967_s7] sm:$0xff] }
 0x1b1   : > { %v1010_v35 = vmul.f32 %v1875_v1, %v1875_v1  ;;  %v1011_v47 = vmul.f32 %v1877_v11, %v1877_v11  ;;  %v1012_v16 = vmul.f32 %v1879_v12, %v1879_v12  ;;  %v1013_v45 = vmul.f32 %v1881_v10, %v1881_v10  ;;  %v1386_v14 = vld [vmem:[%s1968_s8] ss:$0 sm:$0xff] }
 0x1b2   : > { %v1014_v9 = vmul.f32 %v1883_v13, %v1883_v13  ;;  %v1015_v61 = vmul.f32 %v1885_v37, %v1885_v37  ;;  %v1016_v21 = vmul.f32 %v1887_v15, %v1887_v15  ;;  %1175 = vmatpush.msrb.mxu2 %v1123_v24 }
 0x1b3   : > { %v1025_v17 = vrot.slane %v1010_v35, 7  ;;  %v1027_v20 = vrot.slane %v1011_v47, 6  ;;  %v1029_v26 = vrot.slane %v1012_v16, 5  ;;  %v1031_v27 = vrot.slane %v1013_v45, 4 }
 0x1b4   : > { %v1033_v29 = vrot.slane %v1014_v9, 3  ;;  %v1035_v38 = vrot.slane %v1015_v61, 2  ;;  %v1037_v18 = vrot.slane %v1016_v21, 1  ;;  %1176 = vmatpush.msrb.mxu2 %v1122_v43 }
 0x1b5   : > { %v1026_v22 = vsel %vm949_vm6, %v1025_v17, %v1009_v49 }
 0x1b6   : > { %v1028_v5 = vsel %vm951_vm7, %v1027_v20, %v1026_v22  ;;  %1177 = vmatpush.msrb.mxu2 %v1121_v32 }
 0x1b7   : > { %v1030_v28 = vsel %vm953_vm8, %v1029_v26, %v1028_v5 }
 0x1b8   : > { %v1032_v30 = vsel %vm955_vm9, %v1031_v27, %v1030_v28  ;;  %1178 = vmatpush.msrb.mxu2 %v1120_v25 }
 0x1b9   : > { %v1034_v41 = vsel %vm957_vm10, %v1033_v29, %v1032_v30 }
 0x1ba   : > { %v1036_v42 = vsel %vm959_vm11, %v1035_v38, %v1034_v41 }
 0x1bb   : > { %v1038_v19 = vsel %vm961_vm12, %v1037_v18, %v1036_v42 }
 0x1bc   : > { %1056 = vmatmul.f32.vlgmr.msrb.gmra.mxu1 %v1038_v19  ;;  %v1184_v19 = vand.u32 127, %v675_v34 }
 0x1be   : > { %vm1185_vm0 = vcmp.lt.s32.totalorder %v1184_v19, 6 }
 0x239   : > { %v1057_v44 = vpop.f32.mrf.mxu1 }
 0x23a   : > { %v1060_v51 = vmul.f32 0.0625, %v1057_v44 }
 0x23c   : > { %v1061_v52 = vadd.f32 1e-05, %v1060_v51 }
 0x23e   : > { %1387 = vrsqrt.f32 %v1061_v52  ;;  %vm1068_vm14 = vweird.f32 %v1061_v52 }
 0x244   : > { %v1388_v53 = vpop.eup %1387 }
 0x245   : > { %v1063_v54 = vmul.f32 %v1388_v53, %v1061_v52  ;;  %vm1069_vm13 = vweird.f32 %v1388_v53 }
 0x246   : > { %vm1070_vm15 = vmor %vm1068_vm14, %vm1069_vm13 }
 0x247   : > { %v1064_v48 = vmul.f32 %v1388_v53, %v1063_v54 }
 0x249   : > { %v1065_v55 = vmul.f32 0.5, %v1064_v48 }
 0x24b   : > { %v1066_v33 = vsub.f32 1.5, %v1065_v55 }
 0x24d   : > { %v1067_v23 = vmul.f32 %v1388_v53, %v1066_v33 }
 0x24f   : > { %v1071_v59 = vsel %vm1070_vm15, %v1388_v53, %v1067_v23 }
 0x250   : > { %v1073_v39 = vrot.slane %v1071_v59, 1  ;;  %v1074_v56 = vrot.slane %v1071_v59, 2  ;;  %v1075_v58 = vrot.slane %v1071_v59, 3  ;;  %v1076_v57 = vrot.slane %v1071_v59, 4 }
 0x251   : > { %v1077_v60 = vrot.slane %v1071_v59, 5  ;;  %v1078_v62 = vrot.slane %v1071_v59, 6  ;;  %v1079_v31 = vrot.slane %v1071_v59, 7  ;;  %v1088_v63 = vmul.f32 %v1071_v59, %v1870_v8  ;;  %v1385_v8 = vld [vmem:[%s1965_s5] ss:$0 sm:$0xff] }
 0x252   : > { %v1089_v36 = vmul.f32 %v1073_v39, %v1875_v1  ;;  %v1090_v0 = vmul.f32 %v1074_v56, %v1877_v11  ;;  %v1091_v46 = vmul.f32 %v1075_v58, %v1879_v12  ;;  %v1092_v2 = vmul.f32 %v1076_v57, %v1881_v10 }
 0x253   : > { %v1093_v3 = vmul.f32 %v1077_v60, %v1883_v13  ;;  %v1094_v6 = vmul.f32 %v1078_v62, %v1885_v37  ;;  %v1095_v50 = vmul.f32 %v1079_v31, %v1887_v15  ;;  %v1100_v7 = vmul.f32 %v1384_v40, %v1088_v63 }
 0x254   : > { %v1101_v4 = vmul.f32 %v1384_v40, %v1089_v36  ;;  %v1102_v35 = vmul.f32 %v1384_v40, %v1090_v0  ;;  %v1103_v47 = vmul.f32 %v1384_v40, %v1091_v46  ;;  %v1104_v16 = vmul.f32 %v1384_v40, %v1092_v2 }
 0x255   : > { %v1105_v1 = vmul.f32 %v1384_v40, %v1093_v3  ;;  %v1106_v11 = vmul.f32 %v1384_v40, %v1094_v6  ;;  %v1107_v12 = vmul.f32 %v1384_v40, %v1095_v50  ;;  %v1112_v9 = vadd.f32 %v1385_v8, %v1100_v7 }
 0x256   : > { %v1113_v45 = vadd.f32 %v1385_v8, %v1101_v4  ;;  %v1114_v10 = vadd.f32 %v1385_v8, %v1102_v35  ;;  %v1115_v49 = vadd.f32 %v1385_v8, %v1103_v47  ;;  %v1116_v13 = vadd.f32 %v1385_v8, %v1104_v16 }
 0x257   : > { %v1117_v37 = vadd.f32 %v1385_v8, %v1105_v1  ;;  %v1118_v20 = vadd.f32 %v1385_v8, %v1106_v11  ;;  %v1119_v61 = vadd.f32 %v1385_v8, %v1107_v12 }
 0x258   : > { %v1148_v17 = vrot.slane %v1113_v45, 7  ;;  %v1150_v15 = vrot.slane %v1114_v10, 6  ;;  %v1152_v22 = vrot.slane %v1115_v49, 5  ;;  %v1154_v5 = vrot.slane %v1116_v13, 4 }
 0x259   : > { %v1156_v28 = vrot.slane %v1117_v37, 3  ;;  %v1158_v30 = vrot.slane %v1118_v20, 2  ;;  %v1160_v41 = vrot.slane %v1119_v61, 1 }
 0x25a   : > { %v1149_v21 = vsel %vm949_vm6, %v1148_v17, %v1112_v9 }
 0x25b   : > { %v1151_v26 = vsel %vm951_vm7, %v1150_v15, %v1149_v21 }
 0x25c   : > { %v1153_v27 = vsel %vm953_vm8, %v1152_v22, %v1151_v26 }
 0x25d   : > { %v1155_v29 = vsel %vm955_vm9, %v1154_v5, %v1153_v27 }
 0x25e   : > { %v1157_v38 = vsel %vm957_vm10, %v1156_v28, %v1155_v29 }
 0x25f   : > { %v1159_v18 = vsel %vm959_vm11, %v1158_v30, %v1157_v38 }
 0x260   : > { %v1161_v42 = vsel %vm961_vm12, %v1160_v41, %v1159_v18 }
 0x261   : > { %1179 = vmatmul.f32.vlgmr.msrb.gmra.mxu2 %v1161_v42 }
 0x2e4   : > { %v1180_v24 = vpop.f32.mrf.mxu2 }
 0x2e5   : > { %v1181_v43 = vadd.f32 %v1386_v14, %v1180_v24 }
 0x2e7   : > { %v1186_v32 = vsel %vm1185_vm0, %v1181_v43, -1e+30 }
 0x2e8   : > { %1187 = vmax.xlane.f32.xlu0 %v1186_v32 }
 0x35b   : > { %v1188_v25 = vpop.xlane.xlu0 %1187 }
 0x35c   : > { %v1189_v44 = vsub.f32 %v1181_v43, %v1188_v25 }
 0x35e   : > { %v1190_v51 = vmul.f32 1.442695, %v1189_v44 }
 0x360   : > { %1389 = vpow2.f32 %v1190_v51 }
 0x366   : > { %v1390_v52 = vpop.eup %1389 }
 0x367   : > { %v1192_v53 = vsel %vm1185_vm0, %v1390_v52, 0.0 }
 0x368   : > { %1193 = vadd.xlane.f32.xlu0 %v1192_v53 }
 0x3db   : > { %v1194_v54 = vpop.xlane.xlu0 %1193 }
 0x3dc   : > { %1391 = vlog2.f32 %v1194_v54 }
 0x3e2   : > { %v1392_v34 = vpop.eup %1391 }
 0x3e3   : > { %v1196_v48 = vmul.f32 0.6931472, %v1392_v34 }
 0x3e5   : > { %v1197_v55 = vsub.f32 %v1189_v44, %v1196_v48 }
 0x3e7   : > { %1198 = vst [vmem:[%s332_s11] sm:$0xff] %v1197_v55 }
 0x3e8 PF: > { %s19_s30 = sadd.s32 1, %s1399_s30  }
 0x3e9   : > { %p16_p5 = scmp.ge.s32.totalorder %s19_s30, 6  }
 0x3eb   :  { %18 = sbr.rel (!%p16_p5) target bundleno = 1 (0x1), region = 86 }

</bundles_post_ra>
